<compile_context>
chip_gen: v7x
topology: tpu7x:2x2x1
jax: 0.10.0
libtpu: 0.0.40
codegen_flags: <defaults>
</compile_context>

<pallas_src>
import functools

import jax
import jax.numpy as jnp
from jax import lax
from jax.experimental import pallas as pl
from jax.experimental.pallas import tpu as pltpu

LANE = 128
SUB = 8
CHUNK_ROWS = 512              # per-chunk fold: 512x128 f32 = 256 KiB live intermediate
SMALL_INPUT_BYTES = 1 << 21   # below ~2 MiB, fused XLA beats a pallas_call launch


def _round_up(v, m):
    return -(-v // m) * m


def _default_tile_rows():
    """Per-generation row-tile for the streaming SSE reduce (rows of 128 lanes)."""
    try:
        kind = jax.devices()[0].device_kind.lower()
    except Exception:
        kind = ""
    if "v7" in kind:
        return 16384   # 8 MiB f32/block/input; 32 MiB double-buffered (64 MiB VMEM/TC)
    if "v6" in kind:
        return 8192    # 4 MiB/block/input; 16 MiB double-buffered
    return 4096        # v5e & unknown: 2 MiB/block/input; 8 MiB double-buffered


def _pick_block_rows(rows, tile_rows):
    """Choose the per-grid-step row count.

    Keeps at least 2 grid steps for mid-size inputs (so the "parallel" grid
    axis can feed both TensorCores on v7x) and keeps large blocks a multiple
    of CHUNK_ROWS so the in-kernel fold loop divides evenly.
    """
    if rows <= 2 * SUB:
        return rows
    if rows <= tile_rows:
        half = _round_up(rows // 2, SUB)                 # split into ~2 grid steps
        if half >= CHUNK_ROWS:
            half = max(CHUNK_ROWS, (half // CHUNK_ROWS) * CHUNK_ROWS)
        return min(half, rows)
    return tile_rows                                     # tile_rows is a CHUNK_ROWS multiple


def _make_sse_partial_kernel(block_rows, chunk_rows, total_rows, need_mask):
    """Per-grid-step partial sum of squared errors.

    Each step reads one (block_rows, 128) tile of `x` and `y`, walks it in
    chunk_rows-row chunks (bounded VMEM intermediates), folds each chunk into
    several independent (8, 128) accumulators (short VALU dep chains, no
    cross-lane ops), and writes the combined (8, 128) partial to its own
    lane-dense output block. The out-of-bounds row mask is only applied on
    the last grid step (pl.when gated).
    """
    n_chunks = block_rows // chunk_rows
    if chunk_rows % (SUB * 4) == 0:
        nacc = 4
    elif chunk_rows % (SUB * 2) == 0:
        nacc = 2
    else:
        nacc = 1
    grp = chunk_rows // (SUB * nacc)

    def kernel(x_ref, y_ref, o_ref):
        def partial(masked):
            def body(c, acc):
                r0 = pl.multiple_of(c * chunk_rows, chunk_rows)
                xs = x_ref[pl.ds(r0, chunk_rows), :].astype(jnp.float32)
                ys = y_ref[pl.ds(r0, chunk_rows), :].astype(jnp.float32)
                d = ys - xs
                sq = d * d
                if masked:
                    # Rows past the true row count hold unspecified data in the
                    # edge block -> zero them (mask bound = zero-padded row count,
                    # correct because both tensors are host-zero-padded).
                    row = (pl.program_id(0) * block_rows + r0
                           + lax.broadcasted_iota(jnp.int32, (chunk_rows, LANE), 0))
                    sq = jnp.where(row < total_rows, sq, 0.0)
                # (chunk_rows,128) -> (nacc, grp, 8, 128): contiguous 8-row groups
                # match the native vreg tiling; the sum over axis=1 is pure VPU
                # vreg adds, spread across `nacc` independent accumulators.
                part = jnp.sum(sq.reshape(nacc, grp, SUB, LANE), axis=1)
                return acc + part

            acc0 = jnp.zeros((nacc, SUB, LANE), jnp.float32)
            acc = lax.fori_loop(0, n_chunks, body, acc0)
            return jnp.sum(acc, axis=0)

        if need_mask:
            is_last = pl.program_id(0) == pl.num_programs(0) - 1

            @pl.when(is_last)
            def _():
                o_ref[...] = partial(True)

            @pl.when(jnp.logical_not(is_last))
            def _():
                o_ref[...] = partial(False)
        else:
            o_ref[...] = partial(False)

    return kernel


def vae_loss(inp, out, mu, log_var, kld_weight=0.03, force_pallas=False):
    """loss = MSE(out, inp) + kld_weight * (-0.5 * mean(1 + lv - mu^2 - exp(lv)))."""
    n = inp.size
    itemsize = jnp.dtype(inp.dtype).itemsize

    # Tiny O(n_latent) KLD term in plain JAX.
    mu_f = mu.astype(jnp.float32)
    lv_f = log_var.astype(jnp.float32)
    kld_loss = -0.5 * jnp.mean(1.0 + lv_f - mu_f * mu_f - jnp.exp(lv_f))

    if (not force_pallas) and n * itemsize < SMALL_INPUT_BYTES:
        # Small-input fallback: fused XLA elementwise+reduce is strictly faster
        # than a pallas_call launch + partials round trip at these sizes.
        recon_loss = jnp.mean(
            (out.astype(jnp.float32) - inp.astype(jnp.float32)) ** 2)
        return recon_loss + jnp.float32(kld_weight) * kld_loss

    # Flatten without changing dtype (free reshape; no HBM upcast copy).
    xf = jnp.ravel(inp)
    yf = jnp.ravel(out)

    # Pad only if the element count is not a multiple of one (8,128) tile.
    # Zero padding in BOTH tensors contributes 0 to the SSE; mean divides by n.
    pad = (-n) % (SUB * LANE)
    if pad:
        # TODO(synk): a 1-D masked kernel would avoid this copy for unaligned
        # sizes; aligned sizes (the common case, incl. the demo) are copy-free.
        xf = jnp.pad(xf, (0, pad))
        yf = jnp.pad(yf, (0, pad))

    rows = (n + pad) // LANE
    x2 = xf.reshape(rows, LANE)
    y2 = yf.reshape(rows, LANE)

    tile_rows = _default_tile_rows()
    block_rows = _pick_block_rows(rows, tile_rows)
    chunk_rows = CHUNK_ROWS if block_rows % CHUNK_ROWS == 0 else block_rows
    grid_n = pl.cdiv(rows, block_rows)
    need_mask = (rows % block_rows) != 0

    # Explicit VMEM budget: 2 inputs x 2 pipeline buffers x block + slack for
    # the chunk intermediates/partials, so the same code works across the
    # v5e (16 MiB) / v6e (32 MiB) / v7x (32 MiB) scoped defaults.
    block_bytes = block_rows * LANE * itemsize
    vmem_limit = int(2 * 2 * block_bytes + (8 << 20))

    cost = pl.CostEstimate(
        flops=3 * n,
        transcendentals=0,
        bytes_accessed=2 * n * itemsize + grid_n * SUB * LANE * 4,
    )

    partials = pl.pallas_call(
        _make_sse_partial_kernel(block_rows, chunk_rows, rows, need_mask),
        out_shape=jax.ShapeDtypeStruct((grid_n * SUB, LANE), jnp.float32),
        grid_spec=pltpu.PrefetchScalarGridSpec(
            num_scalar_prefetch=0,
            grid=(grid_n,),
            in_specs=[
                pl.BlockSpec((block_rows, LANE), lambda i: (i, 0)),   # input tiles
                pl.BlockSpec((block_rows, LANE), lambda i: (i, 0)),   # recon tiles
            ],
            out_specs=pl.BlockSpec((SUB, LANE), lambda i: (i, 0)),    # per-block partials
        ),
        compiler_params=pltpu.CompilerParams(
            dimension_semantics=("parallel",),
            vmem_limit_bytes=vmem_limit),
        cost_estimate=cost,
    )(x2, y2)

    # Epilogue in plain JAX: O(grid_n * 1024) partial reduce + combine.
    # Note: n is only exact in f32 up to 2^24; rel. error ~1e-7 beyond that.
    recon_loss = jnp.sum(partials) / n
    return recon_loss + jnp.float32(kld_weight) * kld_loss


if __name__ == "__main__":
    key = jax.random.PRNGKey(0)
    k1, k2, k3, k4 = jax.random.split(key, 4)

    # Small shapes consistent with a VAE forward: NCHW recon tensors + latents.
    x = jax.random.normal(k1, (2, 4, 16, 16), jnp.float32)        # input
    y = jax.random.normal(k2, (2, 4, 16, 16), jnp.float32)        # output (recon)
    mu = jax.random.normal(k3, (2, 32), jnp.float32)              # latent mean
    log_var = 0.1 * jax.random.normal(k4, (2, 32), jnp.float32)   # latent log-var

    # Force the Pallas path so the kernel is exercised even at demo size.
    loss_fn = jax.jit(functools.partial(vae_loss, kld_weight=0.03, force_pallas=True))
    loss = loss_fn(x, y, mu, log_var)
    jax.block_until_ready(loss)

    # Auto path (tiny input -> fused-XLA fallback) must agree as well.
    loss_auto = jax.jit(functools.partial(vae_loss, kld_weight=0.03))(x, y, mu, log_var)
    jax.block_until_ready(loss_auto)

    # Pure-JAX reference (matches the PyTorch module semantics).
    recon_ref = jnp.mean((y - x) ** 2)
    kld_ref = -0.5 * jnp.mean(1.0 + log_var - mu ** 2 - jnp.exp(log_var))
    ref = recon_ref + 0.03 * kld_ref
    assert abs(float(loss) - float(ref)) < 1e-4, (float(loss), float(ref))
    assert abs(float(loss_auto) - float(ref)) < 1e-4, (float(loss_auto), float(ref))

    print("KERNEL_OK")
</pallas_src>

<mosaic_0001>
module attributes {stable_mosaic.version = 11 : i64} {
  func.func @kernel(%arg0: i32, %arg1: memref<16x128xf32, #tpu.memory_space<vmem>>, %arg2: memref<16x128xf32, #tpu.memory_space<vmem>>, %arg3: memref<8x128xf32, #tpu.memory_space<vmem>>) attributes {dimension_semantics = [#tpu.dimension_semantics<parallel>], iteration_bounds = array<i64: 1>, scalar_prefetch = 0 : i64, scratch_operands = 0 : i64, tpu.core_type = #tpu.core_type<tc>, window_params = [{transform_indices = @transform_0, window_bounds = array<i64: 16, 128>}, {transform_indices = @transform_1, window_bounds = array<i64: 16, 128>}, {transform_indices = @transform_2, window_bounds = array<i64: 8, 128>}]} {
    %cst = arith.constant 0.000000e+00 : f32
    %0 = vector.broadcast %cst : f32 to vector<2x8x128xf32>
    %c0_i32 = arith.constant 0 : i32
    %c16_i32 = arith.constant 16 : i32
    %1 = arith.muli %c0_i32, %c16_i32 : i32
    %2 = tpu.assume_multiple %1, 16 : i32
    %3 = arith.index_cast %2 : i32 to index
    %c0 = arith.constant 0 : index
    %4 = vector.load %arg1[%3, %c0] : memref<16x128xf32, #tpu.memory_space<vmem>>, vector<16x128xf32>
    %5 = arith.index_cast %2 : i32 to index
    %c0_0 = arith.constant 0 : index
    %6 = vector.load %arg2[%5, %c0_0] : memref<16x128xf32, #tpu.memory_space<vmem>>, vector<16x128xf32>
    %7 = arith.subf %6, %4 : vector<16x128xf32>
    %8 = arith.mulf %7, %7 : vector<16x128xf32>
    %9 = vector.shape_cast %8 : vector<16x128xf32> to vector<2x1x8x128xf32>
    %cst_1 = arith.constant dense<0.000000e+00> : vector<2x8x128xf32>
    %10 = vector.multi_reduction <add>, %9, %cst_1 [1] : vector<2x1x8x128xf32> to vector<2x8x128xf32>
    %11 = arith.addf %0, %10 : vector<2x8x128xf32>
    %c1_i32 = arith.constant 1 : i32
    %cst_2 = arith.constant dense<0.000000e+00> : vector<8x128xf32>
    %12 = vector.multi_reduction <add>, %11, %cst_2 [0] : vector<2x8x128xf32> to vector<8x128xf32>
    %c0_3 = arith.constant 0 : index
    %c0_4 = arith.constant 0 : index
    %13 = vector.load %arg3[%c0_3, %c0_4] : memref<8x128xf32, #tpu.memory_space<vmem>>, vector<8x128xf32>
    tpu.vector_store %arg3[%c0_3, %c0_4], %12 {strides = array<i32>} : memref<8x128xf32, #tpu.memory_space<vmem>>, vector<8x128xf32>,
    return
  }
  func.func @transform_0(%arg0: i32) -> (i32, i32) {
    %c0_i32 = arith.constant 0 : i32
    %c0_i32_0 = arith.constant 0 : i32
    return %arg0, %c0_i32 : i32, i32
  }
  func.func @transform_1(%arg0: i32) -> (i32, i32) {
    %c0_i32 = arith.constant 0 : i32
    %c0_i32_0 = arith.constant 0 : i32
    return %arg0, %c0_i32 : i32, i32
  }
  func.func @transform_2(%arg0: i32) -> (i32, i32) {
    %c0_i32 = arith.constant 0 : i32
    %c0_i32_0 = arith.constant 0 : i32
    return %arg0, %c0_i32 : i32, i32
  }
}

</mosaic_0001>

<bundles_post_ra>
// kernel: vae_loss.1
= control target key start
LH: loop header
LB: loop body
LE: loop exit
PB: predicated region body
PF: predicated region fallthrough
CT: control target
= control target key end

     0   :  { %s59_s0 = inlined_call_operand.vmem [shape: f32[16,128], index: 0, kind: input, shape index: {}]   ;;  %s60_s1 = inlined_call_operand.vmem [shape: f32[16,128], index: 1, kind: input, shape index: {}]   ;;  %s61_s2 = inlined_call_operand.vmem [shape: f32[8,128], index: 2, kind: output, shape index: {}]  }
   0x1   :  { %v11_v0 = vld [vmem:[%s59_s0] sm:$0xff]  ;;  %v12_v1 = vld [vmem:[%s59_s0 + $0x8] sm:$0xff] }
   0x2   :  { %v13_v2 = vld [vmem:[%s60_s1] sm:$0xff]  ;;  %v14_v3 = vld [vmem:[%s60_s1 + $0x8] sm:$0xff] }
   0x3   :  { %v15_v4 = vsub.f32 %v13_v2, %v11_v0  ;;  %v16_v5 = vsub.f32 %v14_v3, %v12_v1 }
   0x5   :  { %v17_v6 = vmul.f32 %v15_v4, %v15_v4  ;;  %v18_v7 = vmul.f32 %v16_v5, %v16_v5 }
   0x7   :  { %v23_v8 = vadd.f32 %v18_v7, %v17_v6 }
   0x9   :  { %24 = vst [vmem:[%s61_s2] sm:$0xff] %v23_v8 }

</bundles_post_ra>
